<compile_context>
chip_gen: v7x
topology: tpu7x:2x2x1
jax: 0.10.0
libtpu: 0.0.40
codegen_flags: <defaults>
</compile_context>

<pallas_src>
import jax
import jax.numpy as jnp
from jax.experimental import pallas as pl
from jax.experimental.pallas import tpu as pltpu

# ---- model hyper-params (mirror the PyTorch module) -------------------------
G_EMBEDDING_DIM = 16
G_HIDDEN_SIZE = 128
G_STRING_LENGTH = 8       # seq len AND number of output classes
G_VOCAB_SIZE = 29         # len(g_vocab)
G_VOCAB_PAD = 128         # vocab rows padded to a full lane tile
G_BATCH_PAD = 8           # batch padded to a full sublane tile
G_OUT_PAD = 128           # output lanes padded -> lane-dense (unmasked) store


# ---- Pallas kernel: fused one-hot gather + RNN recurrence + final linear ----
def rnn_linear_kernel(tok_ref, xw_ref, whh_ref, wlin_ref, blin_ref, y_ref):
    # tok_ref : VMEM (S*Bp, 1) int32  token ids, t-major (row t*Bp + b)
    # xw_ref  : VMEM (Vp, H)   f32    folded table  emb @ W_ih^T (built at init)
    # whh_ref : VMEM (H, H)    f32    = weight_hh_l0.T
    # wlin_ref: VMEM (H, Op)   f32    = linear.weight.T, lane-padded to 128
    # blin_ref: VMEM (1, Op)   f32    = linear.bias, lane-padded to 128
    # y_ref   : VMEM (Bp, Op)  f32    lane-dense logits (wrapper slices [:B,:O])
    SB = tok_ref.shape[0]
    Vp, H = xw_ref.shape
    Bp = y_ref.shape[0]
    S = SB // Bp

    # Hoisted gather: ALL B*S pre-projected input rows in ONE MXU push.
    # onehot[r, v] = (v == token[r]);  x_all = onehot @ (emb @ W_ih^T)
    tok = tok_ref[...]                                            # (S*Bp, 1)
    iota = jax.lax.broadcasted_iota(jnp.int32, (SB, Vp), 1)
    onehot = (iota == tok).astype(jnp.float32)                    # (S*Bp, Vp)
    x_all = jnp.dot(onehot, xw_ref[...],
                    preferred_element_type=jnp.float32)           # (S*Bp, H)

    whh = whh_ref[...]

    # h_0 = tanh(x_0)       (h_{-1} == 0 and bias=False -> skip first h @ W_hh)
    h = jnp.tanh(x_all[0:Bp, :])
    # h_t = tanh(x_t + h_{t-1} @ W_hh^T); h stays in vregs, x_t is a static
    # single-vreg slice of the pre-gathered x_all.
    # TODO(synk): on v5e/v6e consider pltpu.matmul_push_rhs to keep W_hh
    # stationary in the MXU across the 7 steps (check bundle dump first).
    for t in range(1, S):
        h = jnp.tanh(x_all[t * Bp:(t + 1) * Bp, :] +
                     jnp.dot(h, whh, preferred_element_type=jnp.float32))

    # y_pred = h_last @ W_lin^T + b_lin   (lane-dense, unmasked store)
    y_ref[...] = (jnp.dot(h, wlin_ref[...],
                          preferred_element_type=jnp.float32)
                  + blin_ref[...]).astype(y_ref.dtype)


def torch_model_forward(tokens, params, y=None):
    """tokens: (B, S) int32.  Returns logits (B, O) or scalar CE loss if y given."""
    xw, whh_t, wlin_p, blin_p = params
    B, S = tokens.shape
    Bp = G_BATCH_PAD
    Op = wlin_p.shape[1]

    # Pad batch to 8 sublanes (pad rows use token 0 = padding_idx; sliced off),
    # and lay the ids out as a t-major column: row t*Bp + b  ->  tokens[b, t].
    tok_pad = jnp.zeros((Bp, S), jnp.int32).at[:B].set(tokens.astype(jnp.int32))
    tok_col = tok_pad.T.reshape(S * Bp, 1)

    # TODO(synk): if this forward is called in a decode/training loop, amortize
    # the per-call launch + weight DMA (grid over calls or cross-call prefetch).
    y_pad = pl.pallas_call(
        rnn_linear_kernel,
        out_shape=jax.ShapeDtypeStruct((Bp, Op), jnp.float32),
        in_specs=[
            pl.BlockSpec(memory_space=pltpu.MemorySpace.VMEM),   # token column
            pl.BlockSpec(memory_space=pltpu.MemorySpace.VMEM),   # folded xw table
            pl.BlockSpec(memory_space=pltpu.MemorySpace.VMEM),   # W_hh^T
            pl.BlockSpec(memory_space=pltpu.MemorySpace.VMEM),   # W_lin^T (padded)
            pl.BlockSpec(memory_space=pltpu.MemorySpace.VMEM),   # bias (padded)
        ],
        out_specs=pl.BlockSpec(memory_space=pltpu.MemorySpace.VMEM),
    )(tok_col, xw, whh_t, wlin_p, blin_p)

    y_pred = y_pad[:B, :G_STRING_LENGTH]   # drop batch + lane padding

    if y is not None:
        # nn.functional.cross_entropy with integer targets (mean reduction) — glue.
        logz = jax.nn.logsumexp(y_pred, axis=-1)
        picked = jnp.take_along_axis(y_pred, y[:, None], axis=-1)[:, 0]
        return jnp.mean(logz - picked)
    return y_pred


def init_params(key):
    k1, k2, k3, k4, k5 = jax.random.split(key, 5)
    emb = 0.1 * jax.random.normal(k1, (G_VOCAB_SIZE, G_EMBEDDING_DIM), jnp.float32)
    emb = emb.at[0].set(0.0)                                   # padding_idx=0
    w_ih = 0.1 * jax.random.normal(k2, (G_HIDDEN_SIZE, G_EMBEDDING_DIM), jnp.float32)
    w_hh = 0.1 * jax.random.normal(k3, (G_HIDDEN_SIZE, G_HIDDEN_SIZE), jnp.float32)
    w_lin = 0.1 * jax.random.normal(k4, (G_STRING_LENGTH, G_HIDDEN_SIZE), jnp.float32)
    b_lin = 0.1 * jax.random.normal(k5, (G_STRING_LENGTH,), jnp.float32)

    # Layout plumbing (done once at init):
    #  - pad vocab rows 29 -> 128 and fold the input projection:
    #      xw[v] = emb[v] @ W_ih^T     (padded rows are zero)
    #  - pre-transpose W_hh to (in, out),
    #  - lane-pad the output projection 8 -> 128 so the kernel store is unmasked.
    emb_p = jnp.zeros((G_VOCAB_PAD, G_EMBEDDING_DIM), jnp.float32)
    emb_p = emb_p.at[:G_VOCAB_SIZE].set(emb)
    xw = emb_p @ w_ih.T                                        # (Vp, H)
    w_lin_p = jnp.zeros((G_HIDDEN_SIZE, G_OUT_PAD), jnp.float32)
    w_lin_p = w_lin_p.at[:, :G_STRING_LENGTH].set(w_lin.T)
    b_lin_p = jnp.zeros((1, G_OUT_PAD), jnp.float32)
    b_lin_p = b_lin_p.at[0, :G_STRING_LENGTH].set(b_lin)
    return (xw, w_hh.T, w_lin_p, b_lin_p)


def _reference_forward(tokens, params):
    """Pure-JAX reference matching the PyTorch forward (for a sanity check)."""
    xw, whh_t, wlin_p, blin_p = params
    x = jnp.take(xw, tokens, axis=0)                            # (B, S, H)
    B, S, H = x.shape
    h = jnp.zeros((B, H), jnp.float32)
    for t in range(S):
        h = jnp.tanh(x[:, t, :] + h @ whh_t)
    return (h @ wlin_p + blin_p)[:, :G_STRING_LENGTH]


if __name__ == "__main__":
    key = jax.random.PRNGKey(0)
    params = init_params(jax.random.PRNGKey(42))

    B = 2
    tokens = jax.random.randint(key, (B, G_STRING_LENGTH), 0, G_VOCAB_SIZE,
                                dtype=jnp.int32)

    logits = torch_model_forward(tokens, params)
    jax.block_until_ready(logits)
    assert logits.shape == (B, G_STRING_LENGTH)

    ref = _reference_forward(tokens, params)
    assert jnp.allclose(logits, ref, rtol=1e-4, atol=1e-4), "mismatch vs reference"

    # also exercise the loss branch (plain-JAX cross entropy on kernel logits)
    y = jnp.array([1, 3], dtype=jnp.int32)
    loss = torch_model_forward(tokens, params, y)
    jax.block_until_ready(loss)

    # TODO(synk): if batch ever grows (>=16), add a batch grid with
    # dimension_semantics=("parallel",) to shard across v7x's two TensorCores,
    # and consider bf16 weights for the MXU on v6e/v7x.
    print("KERNEL_OK")
</pallas_src>

<mosaic_0001>
module attributes {stable_mosaic.version = 11 : i64} {
  func.func @rnn_linear_kernel(%arg0: memref<64x1xi32, #tpu.memory_space<vmem>>, %arg1: memref<128x128xf32, #tpu.memory_space<vmem>>, %arg2: memref<128x128xf32, #tpu.memory_space<vmem>>, %arg3: memref<128x128xf32, #tpu.memory_space<vmem>>, %arg4: memref<1x128xf32, #tpu.memory_space<vmem>>, %arg5: memref<8x128xf32, #tpu.memory_space<vmem>>) attributes {dimension_semantics = [], scalar_prefetch = 0 : i64, scratch_operands = 0 : i64, tpu.core_type = #tpu.core_type<tc>} {
    %c0 = arith.constant 0 : index
    %c0_0 = arith.constant 0 : index
    %0 = vector.load %arg0[%c0, %c0_0] : memref<64x1xi32, #tpu.memory_space<vmem>>, vector<64x1xi32>
    %1 = tpu.iota {dimensions = array<i32: 1>} : vector<64x128xi32>
    %2 = vector.broadcast %0 : vector<64x1xi32> to vector<64x128xi32>
    %3 = arith.cmpi eq, %1, %2 : vector<64x128xi32>
    %4 = arith.extui %3 : vector<64x128xi1> to vector<64x128xi32>
    %5 = arith.sitofp %4 : vector<64x128xi32> to vector<64x128xf32>
    %c0_1 = arith.constant 0 : index
    %c0_2 = arith.constant 0 : index
    %6 = vector.load %arg1[%c0_1, %c0_2] : memref<128x128xf32, #tpu.memory_space<vmem>>, vector<128x128xf32>
    %cst = arith.constant dense<0.000000e+00> : vector<64x128xf32>
    %7 = tpu.matmul %5, %6, %cst {dimension_numbers = #tpu.dot_dimension_numbers<[1], [0], [0], [1], [0, 0, 1, 1], [], []>} : vector<64x128xf32>, vector<128x128xf32>, vector<64x128xf32> -> vector<64x128xf32>
    %c0_3 = arith.constant 0 : index
    %c0_4 = arith.constant 0 : index
    %8 = vector.load %arg2[%c0_3, %c0_4] : memref<128x128xf32, #tpu.memory_space<vmem>>, vector<128x128xf32>
    %9 = vector.extract_strided_slice %7 {offsets = [0, 0], sizes = [8, 128], strides = [1, 1]} : vector<64x128xf32> to vector<8x128xf32>
    %10 = math.tanh %9 : vector<8x128xf32>
    %11 = vector.extract_strided_slice %7 {offsets = [8, 0], sizes = [8, 128], strides = [1, 1]} : vector<64x128xf32> to vector<8x128xf32>
    %cst_5 = arith.constant dense<0.000000e+00> : vector<8x128xf32>
    %12 = tpu.matmul %10, %8, %cst_5 {dimension_numbers = #tpu.dot_dimension_numbers<[1], [0], [0], [1], [0, 0, 1, 1], [], []>} : vector<8x128xf32>, vector<128x128xf32>, vector<8x128xf32> -> vector<8x128xf32>
    %13 = arith.addf %11, %12 : vector<8x128xf32>
    %14 = math.tanh %13 : vector<8x128xf32>
    %15 = vector.extract_strided_slice %7 {offsets = [16, 0], sizes = [8, 128], strides = [1, 1]} : vector<64x128xf32> to vector<8x128xf32>
    %cst_6 = arith.constant dense<0.000000e+00> : vector<8x128xf32>
    %16 = tpu.matmul %14, %8, %cst_6 {dimension_numbers = #tpu.dot_dimension_numbers<[1], [0], [0], [1], [0, 0, 1, 1], [], []>} : vector<8x128xf32>, vector<128x128xf32>, vector<8x128xf32> -> vector<8x128xf32>
    %17 = arith.addf %15, %16 : vector<8x128xf32>
    %18 = math.tanh %17 : vector<8x128xf32>
    %19 = vector.extract_strided_slice %7 {offsets = [24, 0], sizes = [8, 128], strides = [1, 1]} : vector<64x128xf32> to vector<8x128xf32>
    %cst_7 = arith.constant dense<0.000000e+00> : vector<8x128xf32>
    %20 = tpu.matmul %18, %8, %cst_7 {dimension_numbers = #tpu.dot_dimension_numbers<[1], [0], [0], [1], [0, 0, 1, 1], [], []>} : vector<8x128xf32>, vector<128x128xf32>, vector<8x128xf32> -> vector<8x128xf32>
    %21 = arith.addf %19, %20 : vector<8x128xf32>
    %22 = math.tanh %21 : vector<8x128xf32>
    %23 = vector.extract_strided_slice %7 {offsets = [32, 0], sizes = [8, 128], strides = [1, 1]} : vector<64x128xf32> to vector<8x128xf32>
    %cst_8 = arith.constant dense<0.000000e+00> : vector<8x128xf32>
    %24 = tpu.matmul %22, %8, %cst_8 {dimension_numbers = #tpu.dot_dimension_numbers<[1], [0], [0], [1], [0, 0, 1, 1], [], []>} : vector<8x128xf32>, vector<128x128xf32>, vector<8x128xf32> -> vector<8x128xf32>
    %25 = arith.addf %23, %24 : vector<8x128xf32>
    %26 = math.tanh %25 : vector<8x128xf32>
    %27 = vector.extract_strided_slice %7 {offsets = [40, 0], sizes = [8, 128], strides = [1, 1]} : vector<64x128xf32> to vector<8x128xf32>
    %cst_9 = arith.constant dense<0.000000e+00> : vector<8x128xf32>
    %28 = tpu.matmul %26, %8, %cst_9 {dimension_numbers = #tpu.dot_dimension_numbers<[1], [0], [0], [1], [0, 0, 1, 1], [], []>} : vector<8x128xf32>, vector<128x128xf32>, vector<8x128xf32> -> vector<8x128xf32>
    %29 = arith.addf %27, %28 : vector<8x128xf32>
    %30 = math.tanh %29 : vector<8x128xf32>
    %31 = vector.extract_strided_slice %7 {offsets = [48, 0], sizes = [8, 128], strides = [1, 1]} : vector<64x128xf32> to vector<8x128xf32>
    %cst_10 = arith.constant dense<0.000000e+00> : vector<8x128xf32>
    %32 = tpu.matmul %30, %8, %cst_10 {dimension_numbers = #tpu.dot_dimension_numbers<[1], [0], [0], [1], [0, 0, 1, 1], [], []>} : vector<8x128xf32>, vector<128x128xf32>, vector<8x128xf32> -> vector<8x128xf32>
    %33 = arith.addf %31, %32 : vector<8x128xf32>
    %34 = math.tanh %33 : vector<8x128xf32>
    %35 = vector.extract_strided_slice %7 {offsets = [56, 0], sizes = [8, 128], strides = [1, 1]} : vector<64x128xf32> to vector<8x128xf32>
    %cst_11 = arith.constant dense<0.000000e+00> : vector<8x128xf32>
    %36 = tpu.matmul %34, %8, %cst_11 {dimension_numbers = #tpu.dot_dimension_numbers<[1], [0], [0], [1], [0, 0, 1, 1], [], []>} : vector<8x128xf32>, vector<128x128xf32>, vector<8x128xf32> -> vector<8x128xf32>
    %37 = arith.addf %35, %36 : vector<8x128xf32>
    %38 = math.tanh %37 : vector<8x128xf32>
    %c0_12 = arith.constant 0 : index
    %c0_13 = arith.constant 0 : index
    %39 = vector.load %arg3[%c0_12, %c0_13] : memref<128x128xf32, #tpu.memory_space<vmem>>, vector<128x128xf32>
    %cst_14 = arith.constant dense<0.000000e+00> : vector<8x128xf32>
    %40 = tpu.matmul %38, %39, %cst_14 {dimension_numbers = #tpu.dot_dimension_numbers<[1], [0], [0], [1], [0, 0, 1, 1], [], []>} : vector<8x128xf32>, vector<128x128xf32>, vector<8x128xf32> -> vector<8x128xf32>
    %c0_15 = arith.constant 0 : index
    %c0_16 = arith.constant 0 : index
    %41 = vector.load %arg4[%c0_15, %c0_16] : memref<1x128xf32, #tpu.memory_space<vmem>>, vector<1x128xf32>
    %42 = vector.broadcast %41 : vector<1x128xf32> to vector<8x128xf32>
    %43 = arith.addf %40, %42 : vector<8x128xf32>
    %c0_17 = arith.constant 0 : index
    %c0_18 = arith.constant 0 : index
    %44 = vector.load %arg5[%c0_17, %c0_18] : memref<8x128xf32, #tpu.memory_space<vmem>>, vector<8x128xf32>
    tpu.vector_store %arg5[%c0_17, %c0_18], %43 {strides = array<i32>} : memref<8x128xf32, #tpu.memory_space<vmem>>, vector<8x128xf32>,
    return
  }
}

</mosaic_0001>

<bundles_post_ra>
// kernel: tpu_custom_call.1
= control target key start
LH: loop header
LB: loop body
LE: loop exit
PB: predicated region body
PF: predicated region fallthrough
CT: control target
= control target key end

     0   :  { %10 = vsyncpa [#allocation3], 0  ;;  %s2034_s0 = inlined_call_operand.vmem [shape: s32[64,1], index: 0, kind: input, shape index: {}]   ;;  %s2035_s1 = inlined_call_operand.hbm [shape: f32[128,128], index: 1, kind: input, shape index: {}]   ;;  %s2036_s2 = inlined_call_operand.hbm [shape: f32[128,128], index: 2, kind: input, shape index: {}]   ;;  %s2037_s3 = inlined_call_operand.hbm [shape: f32[128,128], index: 3, kind: input, shape index: {}]   ;;  %s2038_s4 = inlined_call_operand.vmem [shape: f32[1,128], index: 4, kind: input, shape index: {}]   ;;  %s2039_s5 = inlined_call_operand.hbm [shape: f32[8,128], index: 5, kind: output, shape index: {}]  }
   0x1   :  { %11 = vsyncpa [#allocation6], 0 }
   0x2   :  { %12 = vsyncpa [#allocation4], 0  ;;  %s1720_s18 = smov [#allocation5]   ;;  %s1721_s20 = smov [#allocation2]  }
   0x3   :  { %s32_s19 = sshll.u32 %s1720_s18, 4  ;;  %s20_s21 = sshll.u32 %s1721_s20, 4  ;;  %s33_s19 = int_to_ptr.vmem [resolvable:$true] %s32_s19  ;;  %s1761_s21 = int_to_ptr.vmem [resolvable:$true] %s20_s21 }
   0x4   :  { %s1626_s24 = scalar_lea.hbm %s2036_s2, 2048 }
   0x5   :  { %p1627_p0 = scmp.ne.s32.totalorder %s2036_s2, %s1626_s24  ;;  %p1630_p1 = scmp.lt.u32.totalorder %s1626_s24, %s2036_s2 }
   0x7   :  { %p1632_p2 = pnand %p1630_p1, %p1627_p0 }
   0x9   :  { %1635 = shalt.err (!%p1632_p2)
}
   0xa   :  { %s1636_s29 = scalar_lea.vmem %s33_s19, 2048  ;;  %p1641_p4 = scmp.lt.s32.totalorder %s33_s19, %s33_s19 }
   0xb   :  { %p1637_p3 = scmp.ne.s32.totalorder %s33_s19, %s1636_s29  ;;  %p1642_p5 = scmp.lt.s32.totalorder %s1636_s29, %s1636_s29 }
   0xd   :  { %p1643_p6 = por %p1642_p5, %p1641_p4 }
   0xf   :  { %p1644_p7 = pnand %p1643_p6, %p1637_p3 }
  0x11   :  { %1647 = shalt.err (!%p1644_p7)
}
  0x12   :  { %s1722_s30 = smov 128   ;;  %s1723_s6 = smov 8  }
  0x13   :  { %38 = dma.hbm_to_vmem [thread:$0]  %s2036_s2, 2048, %s33_s19, [#allocation6], %s1722_s30, %s1722_s30, %s1723_s6  }
  0x14   :  { %s1648_s11 = scalar_lea.hbm %s2035_s1, 2048 }
  0x15   :  { %p1649_p8 = scmp.ne.s32.totalorder %s2035_s1, %s1648_s11  ;;  %p1652_p9 = scmp.lt.u32.totalorder %s1648_s11, %s2035_s1 }
  0x17   :  { %p1654_p10 = pnand %p1652_p9, %p1649_p8 }
  0x19   :  { %1657 = shalt.err (!%p1654_p10)
}
  0x1a   :  { %s1658_s16 = scalar_lea.vmem %s1761_s21, 2048  ;;  %p1663_p12 = scmp.lt.s32.totalorder %s1761_s21, %s1761_s21 }
  0x1b   :  { %p1659_p11 = scmp.ne.s32.totalorder %s1761_s21, %s1658_s16  ;;  %p1664_p13 = scmp.lt.s32.totalorder %s1658_s16, %s1658_s16 }
  0x1d   :  { %p1665_p0 = por %p1664_p13, %p1663_p12 }
  0x1f   :  { %p1666_p1 = pnand %p1665_p0, %p1659_p11 }
  0x21   :  { %1669 = shalt.err (!%p1666_p1)
}
  0x22   :  { %26 = dma.hbm_to_vmem [thread:$0]  %s2035_s1, 2048, %s1761_s21, [#allocation3], %s1722_s30, %s1722_s30, %s1723_s6  }
  0x23   :  { %s1724_s18 = smov [#allocation7]   ;;  %s1670_s23 = scalar_lea.hbm %s2037_s3, 2048 }
  0x24   :  { %s44_s19 = sshll.u32 %s1724_s18, 4  ;;  %p1671_p2 = scmp.ne.s32.totalorder %s2037_s3, %s1670_s23  ;;  %s45_s19 = int_to_ptr.vmem [resolvable:$true] %s44_s19 }
  0x25   :  { %p1674_p3 = scmp.lt.u32.totalorder %s1670_s23, %s2037_s3 }
  0x27   :  { %p1676_p4 = pnand %p1674_p3, %p1671_p2 }
  0x29   :  { %1679 = shalt.err (!%p1676_p4)
}
  0x2a   :  { %s1680_s28 = scalar_lea.vmem %s45_s19, 2048  ;;  %p1685_p6 = scmp.lt.s32.totalorder %s45_s19, %s45_s19 }
  0x2b   :  { %p1681_p5 = scmp.ne.s32.totalorder %s45_s19, %s1680_s28  ;;  %p1686_p7 = scmp.lt.s32.totalorder %s1680_s28, %s1680_s28 }
  0x2d   :  { %p1687_p8 = por %p1686_p7, %p1685_p6 }
  0x2f   :  { %p1688_p9 = pnand %p1687_p8, %p1681_p5 }
  0x31   :  { %1691 = shalt.err (!%p1688_p9)
}
  0x32   :  { %50 = dma.hbm_to_vmem [thread:$0]  %s2037_s3, 2048, %s45_s19, [#allocation6], %s1722_s30, %s1722_s30, %s1723_s6  }
  0x33   :  { %1714 = dma.done.wait [#allocation3], 2048  }
  0x34   :  { %1715 = vsyncadd [#allocation3], 4294965248 }
  0x35   :  { %1716 = dma.done.wait [#allocation6], 4096  }
  0x36   :  { %1717 = vsyncadd [#allocation6], 4294963200  ;;  %v1725_v0 = vmov 0   ;;  %v62_v1 = vld [vmem:[%s2034_s0] sm:$0xff]  ;;  %v64_v2 = vld [vmem:[%s2034_s0 + $0x10] sm:$0xff]  ;;  %v1726_v26 = vmov 0.0|0.0   ;;  %v70_v48 = vlaneseq }
  0x37   :  { %1608 = vset.pattern.permute.xlu0 %v1725_v0  ;;  %1609 = vset.pattern.permute.xlu1 %v1725_v0  ;;  %v63_v3 = vld [vmem:[%s2034_s0 + $0x8] sm:$0xff]  ;;  %v65_v4 = vld [vmem:[%s2034_s0 + $0x18] sm:$0xff]  ;;  %v120_v5 = vld [vmem:[#allocation2] sm:$0xff]  ;;  %v1727_v52 = vmov 1.0   ;;  %vm1728_vm7 = vmmov 0   ;;  %s1730_s19 = smov [#allocation8]  }
  0x38   :  { %73 = vperm.xlu0 %1608, %v62_v1   ;;  %79 = vperm.xlu1 %1609, %v64_v2   ;;  %v121_v6 = vld [vmem:[#allocation2 + $0x8] sm:$0xff]  ;;  %v122_v8 = vld [vmem:[#allocation2 + $0x10] sm:$0xff]  ;;  %v123_v9 = vld [vmem:[#allocation2 + $0x18] sm:$0xff]  ;;  %v1856_v49 = vand.u32 127, %v70_v48  ;;  %v1729_v2 = vmov 0.0   ;;  %s862_s20 = sshll.u32 %s1730_s19, 4  ;;  %s863_s20 = int_to_ptr.vmem [resolvable:$true] %s862_s20 }
  0x39   :  { %v1373_v7 = vpack.c.bf16 %v121_v6, %v120_v5  ;;  %v1377_v10 = vpack.c.bf16 %v123_v9, %v122_v8  ;;  %v124_v11 = vld [vmem:[#allocation2 + $0x20] sm:$0xff]  ;;  %v125_v12 = vld [vmem:[#allocation2 + $0x28] sm:$0xff]  ;;  %v126_v16 = vld [vmem:[#allocation2 + $0x30] sm:$0xff]  ;;  %1405 = vmatprep.subr.bf16.mxu1 %v1726_v26  ;;  %1125 = vmatprep.mubr.msk.f32.mxu1 %vm1728_vm7, %v1729_v2  ;;  %s1692_s22 = scalar_lea.vmem %s863_s20, 128  ;;  %p1697_p11 = scmp.lt.s32.totalorder %s863_s20, %s863_s20 }
  0x3a   :  { %v66_v13 = vld [vmem:[%s2034_s0 + $0x20] sm:$0xff]  ;;  %v67_v14 = vld [vmem:[%s2034_s0 + $0x28] sm:$0xff]  ;;  %v1381_v15 = vpack.c.bf16 %v125_v12, %v124_v11  ;;  %v127_v17 = vld [vmem:[#allocation2 + $0x38] sm:$0xff]  ;;  %p1693_p10 = scmp.ne.s32.totalorder %s863_s20, %s1692_s22  ;;  %p1698_p12 = scmp.lt.s32.totalorder %s1692_s22, %s1692_s22 }
  0x3b   :  { %1374 = vmatprep.subr.bf16.mxu0 %v1373_v7  ;;  %v68_v18 = vld [vmem:[%s2034_s0 + $0x30] sm:$0xff]  ;;  %v1385_v19 = vpack.c.bf16 %v127_v17, %v126_v16  ;;  %v128_v20 = vld [vmem:[#allocation2 + $0x40] sm:$0xff]  ;;  %v129_v21 = vld [vmem:[#allocation2 + $0x48] sm:$0xff] }
  0x3c   :  { %76 = vperm.xlu0 %1608, %v63_v3   ;;  %82 = vperm.xlu1 %1609, %v65_v4   ;;  %v241_v22 = vld [vmem:[#allocation5] sm:$0xff]  ;;  %v242_v23 = vld [vmem:[#allocation5 + $0x8] sm:$0xff]  ;;  %v243_v24 = vld [vmem:[#allocation5 + $0x10] sm:$0xff]  ;;  %v1389_v25 = vpack.c.bf16 %v129_v21, %v128_v20  ;;  %p1699_p13 = por %p1698_p12, %p1697_p11 }
  0x3d   :  { %1376 = vmatpush3.bf16.msra.mxu0 %v1373_v7  ;;  %v1835_v27 = vpack.c.bf16 %v242_v23, %v241_v22  ;;  %v244_v28 = vld [vmem:[#allocation5 + $0x18] sm:$0xff]  ;;  %v130_v29 = vld [vmem:[#allocation2 + $0x50] sm:$0xff]  ;;  %v245_v32 = vld [vmem:[#allocation5 + $0x20] sm:$0xff] }
  0x3e   :  { %1378 = vmatprep.subr.bf16.mxu0 %v1377_v10  ;;  %v131_v30 = vld [vmem:[#allocation2 + $0x58] sm:$0xff]  ;;  %v1838_v31 = vpack.c.bf16 %v244_v28, %v243_v24  ;;  %v246_v33 = vld [vmem:[#allocation5 + $0x28] sm:$0xff]  ;;  %v132_v35 = vld [vmem:[#allocation2 + $0x60] sm:$0xff]  ;;  %p1700_p0 = pnand %p1699_p13, %p1693_p10 }
  0x3f   :  { %1407 = vmatpush3.bf16.msra.mxu1 %v1835_v27  ;;  %v1393_v34 = vpack.c.bf16 %v131_v30, %v130_v29  ;;  %v133_v36 = vld [vmem:[#allocation2 + $0x68] sm:$0xff]  ;;  %v1842_v37 = vpack.c.bf16 %v246_v33, %v245_v32  ;;  %v247_v38 = vld [vmem:[#allocation5 + $0x30] sm:$0xff]  ;;  %v248_v39 = vld [vmem:[#allocation5 + $0x38] sm:$0xff] }
  0x40   :  { %85 = vperm.xlu0 %1608, %v66_v13   ;;  %88 = vperm.xlu1 %1609, %v67_v14   ;;  %v1397_v40 = vpack.c.bf16 %v133_v36, %v132_v35  ;;  %v134_v41 = vld [vmem:[#allocation2 + $0x70] sm:$0xff]  ;;  %v135_v42 = vld [vmem:[#allocation2 + $0x78] sm:$0xff]  ;;  %v1846_v43 = vpack.c.bf16 %v248_v39, %v247_v38  ;;  %v249_v44 = vld [vmem:[#allocation5 + $0x40] sm:$0xff] }
  0x41   :  { %1380 = vmatpush3.bf16.msra.mxu0 %v1377_v10  ;;  %1408 = vmatprep.subr.bf16.mxu1 %v1726_v26  ;;  %v250_v45 = vld [vmem:[#allocation5 + $0x48] sm:$0xff]  ;;  %v1401_v46 = vpack.c.bf16 %v135_v42, %v134_v41  ;;  %v251_v58 = vld [vmem:[#allocation5 + $0x50] sm:$0xff]  ;;  %v252_v59 = vld [vmem:[#allocation5 + $0x58] sm:$0xff] }
  0x42   :  { %1382 = vmatprep.subr.bf16.mxu0 %v1381_v15  ;;  %v1850_v47 = vpack.c.bf16 %v250_v45, %v249_v44  ;;  %v1882_v60 = vpack.c.bf16 %v252_v59, %v251_v58  ;;  %v253_v61 = vld [vmem:[#allocation5 + $0x60] sm:$0xff]  ;;  %v254_v62 = vld [vmem:[#allocation5 + $0x68] sm:$0xff]  ;;  %v255_v0 = vld [vmem:[#allocation5 + $0x70] sm:$0xff] }
  0x43   :  { %1410 = vmatpush3.bf16.msra.mxu1 %v1838_v31  ;;  %v1887_v63 = vpack.c.bf16 %v254_v62, %v253_v61  ;;  %v256_v1 = vld [vmem:[#allocation5 + $0x78] sm:$0xff]  ;;  %v762_v36 = vld [vmem:[#allocation7] sm:$0xff]  ;;  %v764_v38 = vld [vmem:[#allocation7 + $0x10] sm:$0xff] }
  0x44   :  { %91 = vperm.xlu0 %1608, %v68_v18   ;;  %1411 = vmatprep.subr.bf16.mxu1 %v1726_v26  ;;  %v1893_v3 = vpack.c.bf16 %v256_v1, %v255_v0  ;;  %v69_v4 = vld [vmem:[%s2034_s0 + $0x38] sm:$0xff]  ;;  %v766_v42 = vld [vmem:[#allocation7 + $0x20] sm:$0xff]  ;;  %v768_v45 = vld [vmem:[#allocation7 + $0x30] sm:$0xff] }
  0x45   :  { %1384 = vmatpush3.bf16.msra.mxu0 %v1381_v15  ;;  %94 = vperm.xlu1 %1609, %v69_v4   ;;  %v770_v48 = vld [vmem:[#allocation7 + $0x40] sm:$0xff]  ;;  %v775_v59 = vld [vmem:[#allocation7 + $0x68] sm:$0xff]  ;;  %v776_v61 = vld [vmem:[#allocation7 + $0x70] sm:$0xff] }
  0x46   :  { %1386 = vmatprep.subr.bf16.mxu0 %v1385_v19  ;;  %v774_v58 = vld [vmem:[#allocation7 + $0x60] sm:$0xff]  ;;  %v777_v62 = vld [vmem:[#allocation7 + $0x78] sm:$0xff] }
  0x47   :  { %1413 = vmatpush3.bf16.msra.mxu1 %v1842_v37  ;;  %v888_v4 = vld [vmem:[%s2038_s4] ss:$0 sm:$0xff] }
  0x48   :  { %1414 = vmatprep.subr.bf16.mxu1 %v1726_v26 }
  0x49   :  { %1388 = vmatpush3.bf16.msra.mxu0 %v1385_v19 }
  0x4a   :  { %1390 = vmatprep.subr.bf16.mxu0 %v1389_v25 }
  0x4b   :  { %1416 = vmatpush3.bf16.msra.mxu1 %v1846_v43 }
  0x4c   :  { %1417 = vmatprep.subr.bf16.mxu1 %v1726_v26 }
  0x4d   :  { %1392 = vmatpush3.bf16.msra.mxu0 %v1389_v25 }
  0x4e   :  { %1394 = vmatprep.subr.bf16.mxu0 %v1393_v34 }
  0x4f   :  { %1419 = vmatpush3.bf16.msra.mxu1 %v1850_v47 }
  0x50   :  { %1420 = vmatprep.subr.bf16.mxu1 %v1726_v26 }
  0x51   :  { %1396 = vmatpush3.bf16.msra.mxu0 %v1393_v34 }
  0x52   :  { %1398 = vmatprep.subr.bf16.mxu0 %v1397_v40 }
  0x53   :  { %1422 = vmatpush3.bf16.msra.mxu1 %v1882_v60 }
  0x54   :  { %1423 = vmatprep.subr.bf16.mxu1 %v1726_v26 }
  0x55   :  { %1400 = vmatpush3.bf16.msra.mxu0 %v1397_v40  ;;  %v765_v40 = vld [vmem:[#allocation7 + $0x18] sm:$0xff] }
  0x56   :  { %1402 = vmatprep.subr.bf16.mxu0 %v1401_v46  ;;  %v1577_v41 = vpack.c.bf16 %v765_v40, %v764_v38 }
  0x57   :  { %1425 = vmatpush3.bf16.msra.mxu1 %v1887_v63 }
  0x58   :  { %1426 = vmatprep.subr.bf16.mxu1 %v1726_v26 }
  0x59   :  { %1404 = vmatpush3.bf16.msra.mxu0 %v1401_v46  ;;  %v769_v46 = vld [vmem:[#allocation7 + $0x38] sm:$0xff] }
  0x5a   :  { %1429 = vmatprep.subr.bf16.mxu0 %v1726_v26 }
  0x5b   :  { %1428 = vmatpush3.bf16.msra.mxu1 %v1893_v3 }
  0x5c   :  { %1453 = vmatprep.subr.bf16.mxu1 %v1726_v26 }
  0xb7   :  { %v74_v50 = vpop.permute.xlu0 %73  ;;  %v80_v51 = vpop.permute.xlu1 %79 }
  0xb8   :  { %vm96_vm0 = vcmp.eq.s32.totalorder %v1856_v49, %v74_v50  ;;  %vm98_vm1 = vcmp.eq.s32.totalorder %v1856_v49, %v80_v51 }
  0xb9   :  { %1081 = vmatprep.mubr.msk.f32.mxu0 %vm96_vm0, %v1727_v52 }
  0xbb   :  { %v77_v53 = vpop.permute.xlu0 %76  ;;  %v83_v54 = vpop.permute.xlu1 %82 }
  0xbc   :  { %vm97_vm2 = vcmp.eq.s32.totalorder %v1856_v49, %v77_v53  ;;  %vm99_vm3 = vcmp.eq.s32.totalorder %v1856_v49, %v83_v54 }
  0xbd   :  { %1082 = vmatmul.mubr.msk.f32.vlgmr.msra.gmra.mrb[0].mxu0 %vm97_vm2, %v1727_v52 }
  0xbe   :  { %1084 = vmatprep.mubr.msk.f32.mxu0 %vm98_vm1, %v1727_v52  ;;  %1431 = vmatpush3.bf16.msra.mxu0 %v1835_v27 }
  0xbf   :  { %v86_v55 = vpop.permute.xlu0 %85  ;;  %v89_v56 = vpop.permute.xlu1 %88  ;;  %1432 = vmatprep.subr.bf16.mxu0 %v1726_v26 }
  0xc0   :  { %vm100_vm4 = vcmp.eq.s32.totalorder %v1856_v49, %v86_v55  ;;  %vm101_vm5 = vcmp.eq.s32.totalorder %v1856_v49, %v89_v56  ;;  %v772_v55 = vld [vmem:[#allocation7 + $0x50] sm:$0xff]  ;;  %v773_v56 = vld [vmem:[#allocation7 + $0x58] sm:$0xff] }
  0xc1   :  { %1085 = vmatmul.mubr.msk.f32.gmra.mrb[2].mxu0 %vm99_vm3, %v1727_v52 }
  0xc2   :  { %1087 = vmatprep.mubr.msk.f32.mxu0 %vm100_vm4, %v1727_v52  ;;  %1434 = vmatpush3.bf16.msra.mxu0 %v1838_v31 }
  0xc3   :  { %v92_v57 = vpop.permute.xlu0 %91  ;;  %1435 = vmatprep.subr.bf16.mxu0 %v1726_v26 }
  0xc4   :  { %vm102_vm6 = vcmp.eq.s32.totalorder %v1856_v49, %v92_v57  ;;  %v95_v8 = vpop.permute.xlu1 %94  ;;  %v1589_v57 = vpack.c.bf16 %v773_v56, %v772_v55 }
  0xc5   :  { %1088 = vmatmul.mubr.msk.f32.gmra.mrb[4].mxu0 %vm101_vm5, %v1727_v52  ;;  %vm103_vm8 = vcmp.eq.s32.totalorder %v1856_v49, %v95_v8  ;;  %v771_v49 = vld [vmem:[#allocation7 + $0x48] sm:$0xff] }
  0xc6   :  { %1090 = vmatprep.mubr.msk.f32.mxu0 %vm102_vm6, %v1727_v52  ;;  %1437 = vmatpush3.bf16.msra.mxu0 %v1842_v37  ;;  %v1586_v50 = vpack.c.bf16 %v771_v49, %v770_v48 }
  0xc7   :  { %1438 = vmatprep.subr.bf16.mxu0 %v1726_v26 }
  0xc9   :  { %1091 = vmatmul.mubr.msk.f32.gmra.mrb[6].mxu0 %vm103_vm8, %v1727_v52 }
  0xca   :  { %1440 = vmatpush3.bf16.msra.mxu0 %v1846_v43  ;;  %1160 = vmatprep.mubr.msk.f32.mxu0 %vm1728_vm7, %v1729_v2 }
  0xcb   :  { %1441 = vmatprep.subr.bf16.mxu0 %v1726_v26 }
  0xce   :  { %1443 = vmatpush3.bf16.msra.mxu0 %v1850_v47 }
  0xcf   :  { %1444 = vmatprep.subr.bf16.mxu0 %v1726_v26 }
  0xd2   :  { %1446 = vmatpush3.bf16.msra.mxu0 %v1882_v60 }
  0xd3   :  { %1447 = vmatprep.subr.bf16.mxu0 %v1726_v26 }
  0xd6   :  { %1449 = vmatpush3.bf16.msra.mxu0 %v1887_v63 }
  0xd7   :  { %1450 = vmatprep.subr.bf16.mxu0 %v1726_v26 }
  0xda   :  { %1452 = vmatpush3.bf16.msra.mxu0 %v1893_v3 }
  0xdb   :  { %1477 = vmatprep.subr.bf16.mxu0 %v1726_v26 }
 0x190   :  { %v1083_v5 = vpop.f32.mrb[0].mxu0 }
 0x191   :  { %v202_v6 = vpop.f32.mrb[1].mxu0 }
 0x192   :  { %1610 = vtanh.f32 %v202_v6 }
 0x194   :  { %v1086_v9 = vpop.f32.mrb[2].mxu0 }
 0x195   :  { %v212_v10 = vpop.f32.mrb[3].mxu0 }
 0x198   :  { %v1927_v11 = vpop.f32.mrb[4].mxu0 }
 0x199   :  { %v1929_v12 = vpop.f32.mrb[5].mxu0 }
 0x19c   :  { %v1611_v7 = vpop.eup %1610  ;;  %v1931_v16 = vpop.f32.mrb[6].mxu0 }
 0x19d   :  { %1126 = vmatmul.mubr.f32.vlgmr.msra.gmra.mrb[0].mxu1 %v1611_v7  ;;  %v1933_v17 = vpop.f32.mrb[7].mxu0 }
 0x19e   :  { %1455 = vmatpush3.bf16.msra.mxu1 %v1835_v27  ;;  %1195 = vmatprep.mubr.msk.f32.mxu1 %vm1728_vm7, %v1729_v2 }
 0x19f   :  { %1456 = vmatprep.subr.bf16.mxu1 %v1726_v26 }
 0x1a2   :  { %1458 = vmatpush3.bf16.msra.mxu1 %v1838_v31 }
 0x1a3   :  { %1459 = vmatprep.subr.bf16.mxu1 %v1726_v26 }
 0x1a6   :  { %1461 = vmatpush3.bf16.msra.mxu1 %v1842_v37 }
 0x1a7   :  { %1462 = vmatprep.subr.bf16.mxu1 %v1726_v26 }
 0x1aa   :  { %1464 = vmatpush3.bf16.msra.mxu1 %v1846_v43 }
 0x1ab   :  { %1465 = vmatprep.subr.bf16.mxu1 %v1726_v26 }
 0x1ae   :  { %1467 = vmatpush3.bf16.msra.mxu1 %v1850_v47 }
 0x1af   :  { %1468 = vmatprep.subr.bf16.mxu1 %v1726_v26 }
 0x1b2   :  { %1470 = vmatpush3.bf16.msra.mxu1 %v1882_v60 }
 0x1b3   :  { %1471 = vmatprep.subr.bf16.mxu1 %v1726_v26 }
 0x1b6   :  { %1473 = vmatpush3.bf16.msra.mxu1 %v1887_v63 }
 0x1b7   :  { %1474 = vmatprep.subr.bf16.mxu1 %v1726_v26 }
 0x1ba   :  { %1476 = vmatpush3.bf16.msra.mxu1 %v1893_v3 }
 0x1bb   :  { %1501 = vmatprep.subr.bf16.mxu1 %v1726_v26 }
 0x270   :  { %v324_v13 = vpop.f32.mrb[0].mxu1 }
 0x271   :  { %v328_v14 = vadd.f32 %v1083_v5, %v324_v13  ;;  %v1127_v15 = vpop.f32.mrb[1].mxu1 }
 0x273   :  { %1612 = vtanh.f32 %v328_v14 }
 0x27d   :  { %v1613_v18 = vpop.eup %1612 }
 0x27e   :  { %1161 = vmatmul.mubr.f32.vlgmr.msra.gmra.mrb[8].mxu0 %v1613_v18 }
 0x27f   :  { %1479 = vmatpush3.bf16.msra.mxu0 %v1835_v27  ;;  %1230 = vmatprep.mubr.msk.f32.mxu0 %vm1728_vm7, %v1729_v2 }
 0x280   :  { %1480 = vmatprep.subr.bf16.mxu0 %v1726_v26 }
 0x283   :  { %1482 = vmatpush3.bf16.msra.mxu0 %v1838_v31 }
 0x284   :  { %1483 = vmatprep.subr.bf16.mxu0 %v1726_v26 }
 0x287   :  { %1485 = vmatpush3.bf16.msra.mxu0 %v1842_v37 }
 0x288   :  { %1486 = vmatprep.subr.bf16.mxu0 %v1726_v26 }
 0x28b   :  { %1488 = vmatpush3.bf16.msra.mxu0 %v1846_v43 }
 0x28c   :  { %1489 = vmatprep.subr.bf16.mxu0 %v1726_v26 }
 0x28f   :  { %1491 = vmatpush3.bf16.msra.mxu0 %v1850_v47 }
 0x290   :  { %1492 = vmatprep.subr.bf16.mxu0 %v1726_v26 }
 0x293   :  { %1494 = vmatpush3.bf16.msra.mxu0 %v1882_v60 }
 0x294   :  { %1495 = vmatprep.subr.bf16.mxu0 %v1726_v26 }
 0x297   :  { %1497 = vmatpush3.bf16.msra.mxu0 %v1887_v63 }
 0x298   :  { %1498 = vmatprep.subr.bf16.mxu0 %v1726_v26 }
 0x29b   :  { %1500 = vmatpush3.bf16.msra.mxu0 %v1893_v3 }
 0x29c   :  { %1525 = vmatprep.subr.bf16.mxu0 %v1726_v26 }
 0x351   :  { %v396_v19 = vpop.f32.mrb[8].mxu0 }
 0x352   :  { %v400_v20 = vadd.f32 %v396_v19, %v212_v10  ;;  %v1162_v21 = vpop.f32.mrb[9].mxu0 }
 0x354   :  { %1614 = vtanh.f32 %v400_v20 }
 0x35e   :  { %v1615_v22 = vpop.eup %1614 }
 0x35f   :  { %1196 = vmatmul.mubr.f32.vlgmr.msra.gmra.mrb[2].mxu1 %v1615_v22 }
 0x360   :  { %1503 = vmatpush3.bf16.msra.mxu1 %v1835_v27  ;;  %1265 = vmatprep.mubr.msk.f32.mxu1 %vm1728_vm7, %v1729_v2 }
 0x361   :  { %1504 = vmatprep.subr.bf16.mxu1 %v1726_v26 }
 0x364   :  { %1506 = vmatpush3.bf16.msra.mxu1 %v1838_v31 }
 0x365   :  { %1507 = vmatprep.subr.bf16.mxu1 %v1726_v26 }
 0x368   :  { %1509 = vmatpush3.bf16.msra.mxu1 %v1842_v37 }
 0x369   :  { %1510 = vmatprep.subr.bf16.mxu1 %v1726_v26 }
 0x36c   :  { %1512 = vmatpush3.bf16.msra.mxu1 %v1846_v43 }
 0x36d   :  { %1513 = vmatprep.subr.bf16.mxu1 %v1726_v26 }
 0x370   :  { %1515 = vmatpush3.bf16.msra.mxu1 %v1850_v47 }
 0x371   :  { %1516 = vmatprep.subr.bf16.mxu1 %v1726_v26 }
 0x374   :  { %1518 = vmatpush3.bf16.msra.mxu1 %v1882_v60 }
 0x375   :  { %1519 = vmatprep.subr.bf16.mxu1 %v1726_v26 }
 0x378   :  { %1521 = vmatpush3.bf16.msra.mxu1 %v1887_v63 }
 0x379   :  { %1522 = vmatprep.subr.bf16.mxu1 %v1726_v26 }
 0x37c   :  { %1524 = vmatpush3.bf16.msra.mxu1 %v1893_v3 }
 0x37d   :  { %1549 = vmatprep.subr.bf16.mxu1 %v1726_v26 }
 0x432   :  { %v468_v23 = vpop.f32.mrb[2].mxu1 }
 0x433   :  { %v472_v24 = vadd.f32 %v1086_v9, %v468_v23  ;;  %v1197_v25 = vpop.f32.mrb[3].mxu1 }
 0x435   :  { %1616 = vtanh.f32 %v472_v24 }
 0x43f   :  { %v1617_v28 = vpop.eup %1616 }
 0x440   :  { %1231 = vmatmul.mubr.f32.vlgmr.msra.gmra.mrb[10].mxu0 %v1617_v28 }
 0x441   :  { %1527 = vmatpush3.bf16.msra.mxu0 %v1835_v27  ;;  %1300 = vmatprep.mubr.msk.f32.mxu0 %vm1728_vm7, %v1729_v2 }
 0x442   :  { %1528 = vmatprep.subr.bf16.mxu0 %v1726_v26 }
 0x445   :  { %1530 = vmatpush3.bf16.msra.mxu0 %v1838_v31 }
 0x446   :  { %1531 = vmatprep.subr.bf16.mxu0 %v1726_v26 }
 0x449   :  { %1533 = vmatpush3.bf16.msra.mxu0 %v1842_v37 }
 0x44a   :  { %1534 = vmatprep.subr.bf16.mxu0 %v1726_v26 }
 0x44d   :  { %1536 = vmatpush3.bf16.msra.mxu0 %v1846_v43 }
 0x44e   :  { %1537 = vmatprep.subr.bf16.mxu0 %v1726_v26 }
 0x451   :  { %1539 = vmatpush3.bf16.msra.mxu0 %v1850_v47 }
 0x452   :  { %1540 = vmatprep.subr.bf16.mxu0 %v1726_v26 }
 0x455   :  { %1542 = vmatpush3.bf16.msra.mxu0 %v1882_v60 }
 0x456   :  { %1543 = vmatprep.subr.bf16.mxu0 %v1726_v26 }
 0x459   :  { %1545 = vmatpush3.bf16.msra.mxu0 %v1887_v63 }
 0x45a   :  { %1546 = vmatprep.subr.bf16.mxu0 %v1726_v26 }
 0x45d   :  { %1548 = vmatpush3.bf16.msra.mxu0 %v1893_v3 }
 0x45e   :  { %1573 = vmatprep.subr.bf16.mxu0 %v1726_v26 }
 0x513   :  { %v540_v29 = vpop.f32.mrb[10].mxu0 }
 0x514   :  { %v544_v30 = vadd.f32 %v540_v29, %v1929_v12  ;;  %v1232_v32 = vpop.f32.mrb[11].mxu0 }
 0x516   :  { %1618 = vtanh.f32 %v544_v30 }
 0x520   :  { %v1619_v33 = vpop.eup %1618 }
 0x521   :  { %1266 = vmatmul.mubr.f32.vlgmr.msra.gmra.mrb[4].mxu1 %v1619_v33 }
 0x522   :  { %1551 = vmatpush3.bf16.msra.mxu1 %v1835_v27  ;;  %1335 = vmatprep.mubr.msk.f32.mxu1 %vm1728_vm7, %v1729_v2 }
 0x523   :  { %1552 = vmatprep.subr.bf16.mxu1 %v1726_v26 }
 0x526   :  { %1554 = vmatpush3.bf16.msra.mxu1 %v1838_v31 }
 0x527   :  { %1555 = vmatprep.subr.bf16.mxu1 %v1726_v26 }
 0x52a   :  { %1557 = vmatpush3.bf16.msra.mxu1 %v1842_v37  ;;  %v763_v37 = vld [vmem:[#allocation7 + $0x8] sm:$0xff] }
 0x52b   :  { %1558 = vmatprep.subr.bf16.mxu1 %v1726_v26  ;;  %v1574_v39 = vpack.c.bf16 %v763_v37, %v762_v36 }
 0x52e   :  { %1560 = vmatpush3.bf16.msra.mxu1 %v1846_v43  ;;  %v767_v43 = vld [vmem:[#allocation7 + $0x28] sm:$0xff] }
 0x52f   :  { %1561 = vmatprep.subr.bf16.mxu1 %v1726_v26  ;;  %v1580_v44 = vpack.c.bf16 %v767_v43, %v766_v42 }
 0x532   :  { %1563 = vmatpush3.bf16.msra.mxu1 %v1850_v47  ;;  %v1583_v47 = vpack.c.bf16 %v769_v46, %v768_v45 }
 0x533   :  { %1564 = vmatprep.subr.bf16.mxu1 %v1726_v26 }
 0x536   :  { %1566 = vmatpush3.bf16.msra.mxu1 %v1882_v60  ;;  %v1592_v60 = vpack.c.bf16 %v775_v59, %v774_v58 }
 0x537   :  { %1567 = vmatprep.subr.bf16.mxu1 %v1726_v26 }
 0x53a   :  { %1569 = vmatpush3.bf16.msra.mxu1 %v1887_v63  ;;  %v1595_v63 = vpack.c.bf16 %v777_v62, %v776_v61 }
 0x53b   :  { %1570 = vmatprep.subr.bf16.mxu1 %v1726_v26 }
 0x53e   :  { %1572 = vmatpush3.bf16.msra.mxu1 %v1893_v3 }
 0x5f4   :  { %v612_v27 = vpop.f32.mrb[4].mxu1 }
 0x5f5   :  { %v616_v31 = vadd.f32 %v1927_v11, %v612_v27  ;;  %v1267_v34 = vpop.f32.mrb[5].mxu1 }
 0x5f7   :  { %1620 = vtanh.f32 %v616_v31 }
 0x601   :  { %v1621_v35 = vpop.eup %1620 }
 0x602   :  { %1301 = vmatmul.mubr.f32.vlgmr.msra.gmra.mrb[12].mxu0 %v1621_v35 }
 0x603   :  { %1370 = vmatprep.mubr.msk.f32.mxu0 %vm1728_vm7, %v1729_v2  ;;  %1575 = vmatpush3.bf16.msra.mxu0 %v1574_v39 }
 0x604   :  { %1576 = vmatprep.subr.bf16.mxu0 %v1726_v26 }
 0x607   :  { %1578 = vmatpush3.bf16.msra.mxu0 %v1577_v41 }
 0x608   :  { %1579 = vmatprep.subr.bf16.mxu0 %v1726_v26 }
 0x60b   :  { %1581 = vmatpush3.bf16.msra.mxu0 %v1580_v44 }
 0x60c   :  { %1582 = vmatprep.subr.bf16.mxu0 %v1726_v26 }
 0x60f   :  { %1584 = vmatpush3.bf16.msra.mxu0 %v1583_v47 }
 0x610   :  { %1585 = vmatprep.subr.bf16.mxu0 %v1726_v26 }
 0x613   :  { %1587 = vmatpush3.bf16.msra.mxu0 %v1586_v50 }
 0x614   :  { %1588 = vmatprep.subr.bf16.mxu0 %v1726_v26 }
 0x617   :  { %1590 = vmatpush3.bf16.msra.mxu0 %v1589_v57 }
 0x618   :  { %1591 = vmatprep.subr.bf16.mxu0 %v1726_v26 }
 0x61b   :  { %1593 = vmatpush3.bf16.msra.mxu0 %v1592_v60 }
 0x61c   :  { %1594 = vmatprep.subr.bf16.mxu0 %v1726_v26 }
 0x61f   :  { %1596 = vmatpush3.bf16.msra.mxu0 %v1595_v63 }
 0x6d5   :  { %v684_v51 = vpop.f32.mrb[12].mxu0 }
 0x6d6   :  { %v688_v52 = vadd.f32 %v684_v51, %v1933_v17  ;;  %v1302_v53 = vpop.f32.mrb[13].mxu0 }
 0x6d8   :  { %1622 = vtanh.f32 %v688_v52 }
 0x6e2   :  { %v1623_v54 = vpop.eup %1622 }
 0x6e3   :  { %1336 = vmatmul.mubr.f32.vlgmr.msra.gmra.mrb[6].mxu1 %v1623_v54 }
 0x7b6   :  { %v756_v0 = vpop.f32.mrb[6].mxu1 }
 0x7b7   :  { %v760_v1 = vadd.f32 %v1931_v16, %v756_v0  ;;  %v1337_v2 = vpop.f32.mrb[7].mxu1 }
 0x7b9   :  { %1624 = vtanh.f32 %v760_v1 }
 0x7c3   :  { %v1625_v3 = vpop.eup %1624 }
 0x7c4   :  { %1371 = vmatmul.mubr.f32.vlgmr.msra.gmra.mrb[14].mxu0 %v1625_v3 }
 0x897   :  { %v851_v5 = vpop.f32.mrb[14].mxu0 }
 0x898   :  { %v852_v6 = vadd.f32 %v888_v4, %v851_v5  ;;  %v1372_v7 = vpop.f32.mrb[15].mxu0 }
 0x89a   :  { %855 = vst [vmem:[#allocation8] sm:$0xff] %v852_v6 }
 0x89b   :  { %1703 = shalt.err (!%p1700_p0)
}
 0x89c   :  { %s1704_s25 = scalar_lea.hbm %s2039_s5, 128 }
 0x89d   :  { %p1705_p1 = scmp.ne.s32.totalorder %s2039_s5, %s1704_s25  ;;  %p1708_p2 = scmp.lt.u32.totalorder %s1704_s25, %s2039_s5 }
 0x89f   :  { %p1710_p3 = pnand %p1708_p2, %p1705_p1 }
 0x8a1   :  { %1713 = shalt.err (!%p1710_p3)
}
 0x8a2   :  { %865 = dma.vmem_to_hbm [thread:$0]  %s863_s20, 128, %s2039_s5, [#allocation4]  }
 0x8a3   :  { %1718 = dma.done.wait [#allocation4], 128  }
 0x8a4   :  { %1719 = vsyncadd [#allocation4], 4294967168 }
 0x8a5   :  { %869 = vsyncpa [#allocation3], 1 }
 0x8a6   :  { %870 = vsyncpa [#allocation6], 1 }
 0x8a7   :  { %871 = vsyncpa [#allocation4], 1 }

</bundles_post_ra>
